<compile_context>
chip_gen: v7x
topology: tpu7x:2x2x1
jax: 0.10.0
libtpu: 0.0.40
codegen_flags: <defaults>
</compile_context>

<pallas_src>
import jax
import jax.numpy as jnp
from jax.experimental import pallas as pl
from jax.experimental.pallas import tpu as pltpu


def _make_outconv_kernel(c_in: int, c_out: int):
    """1x1 conv on dense (rows, 128) spatial tiles.

    ci-outer / co-inner: each input channel tile is loaded from VMEM once and
    accumulated into C_out accumulators (C_out is small for OutConv, so vreg /
    VMEM pressure from the live accumulators is negligible).
    """
    def kernel(w_ref, b_ref, x_ref, o_ref):
        # w_ref: SMEM (c_out, c_in) f32      b_ref: SMEM (c_out,) f32
        # x_ref: VMEM (1, c_in,  rows, 128)  o_ref: VMEM (1, c_out, rows, 128)
        x0 = x_ref[0, 0]                                  # (rows, 128) dense tile
        accs = [x0 * w_ref[co, 0] for co in range(c_out)]
        for ci in range(1, c_in):
            xc = x_ref[0, ci]                             # loaded once per ci
            for co in range(c_out):
                accs[co] = accs[co] + xc * w_ref[co, ci]
        for co in range(c_out):
            o_ref[0, co] = (accs[co] + b_ref[co]).astype(o_ref.dtype)

    return kernel


def _pick_row_tile(total_rows, c_in, c_out, n_batch, *,
                   vmem_budget_bytes=24 << 20, max_rows=1024, min_total_steps=8):
    """Rows (of 128 px each) per spatial tile.

    - VMEM: double-buffered f32 in+out tiles fit the budget.  With the
      (rows, 128) layout the channel axis is a leading dim, so the footprint is
      exactly 2*(c_in+c_out)*rows*128*4 bytes (no sublane padding).  24 MiB of
      buffers + 32 MiB scoped limit fits every generation, including v7x's
      64 MiB physical VMEM.
    - Layout: rows is a multiple of 8 (or the full dim) -> legal (8,128) blocks.
    - Megacore / v7x: cap the tile so the grid has >= min_total_steps steps
      when the problem is big enough, so both TensorCores get balanced work.
    """
    bytes_per_row = 2 * (c_in + c_out) * 128 * 4      # 2 = pipeline double-buffer
    rows = vmem_budget_bytes // bytes_per_row
    rows = min(rows, max_rows)

    desired_tiles = -(-min_total_steps // max(1, n_batch))     # ceil
    if desired_tiles > 1 and total_rows >= 8 * desired_tiles:
        rows = min(rows, total_rows // desired_tiles)

    rows = max(8, (rows // 8) * 8)                    # sublane-dense
    if total_rows <= rows:
        return total_rows                             # full-dim block (always legal)
    return rows                                       # ragged last block is masked


def outconv_forward(x_nchw, weight, bias):
    """1x1 conv forward, matching nn.Conv2d(C_in, C_out, kernel_size=1).

    x_nchw : (N, C_in, H, W)      float32
    weight : (C_out, C_in, 1, 1)  float32  (PyTorch Conv2d layout)
    bias   : (C_out,)             float32
    returns: (N, C_out, H, W)     float32
    """
    N, C_in, H, W = x_nchw.shape
    C_out = weight.shape[0]
    HW = H * W
    LANES = 128

    w2 = weight.reshape(C_out, C_in)
    b1 = bias.reshape(C_out)

    # Fold spatial into (rows, 128) so the last two block dims are lane/sublane
    # dense.  Power-of-two H*W (the UNet case) makes this a free reshape.
    HW_pad = -(-HW // LANES) * LANES
    x3 = x_nchw.reshape(N, C_in, HW)
    if HW_pad != HW:
        # TODO(synk): ragged H*W pays one pad/slice pass; never hit for the
        # usual power-of-two UNet spatial sizes.
        x3 = jnp.pad(x3, ((0, 0), (0, 0), (0, HW_pad - HW)))
    total_rows = HW_pad // LANES
    x4 = x3.reshape(N, C_in, total_rows, LANES)

    rows = _pick_row_tile(total_rows, C_in, C_out, N)
    grid = (N, pl.cdiv(total_rows, rows))

    out4 = pl.pallas_call(
        _make_outconv_kernel(C_in, C_out),
        out_shape=jax.ShapeDtypeStruct((N, C_out, total_rows, LANES), x_nchw.dtype),
        grid=grid,
        in_specs=[
            pl.BlockSpec(memory_space=pltpu.MemorySpace.SMEM),   # weight (scalars)
            pl.BlockSpec(memory_space=pltpu.MemorySpace.SMEM),   # bias   (scalars)
            pl.BlockSpec((1, C_in, rows, LANES), lambda n, s: (n, 0, s, 0)),
        ],
        out_specs=pl.BlockSpec((1, C_out, rows, LANES), lambda n, s: (n, 0, s, 0)),
        compiler_params=pltpu.CompilerParams(
            dimension_semantics=("parallel", "parallel"),
            vmem_limit_bytes=32 * 1024 * 1024,
        ),
    )(w2, b1, x4)

    out3 = out4.reshape(N, C_out, HW_pad)
    if HW_pad != HW:
        out3 = out3[:, :, :HW]
    return out3.reshape(N, C_out, H, W)


outconv_forward_jit = jax.jit(outconv_forward)


if __name__ == "__main__":
    # Module config (synthetic, deterministic init — no checkpoint loading).
    in_channels, out_channels = 4, 3
    N, H, W = 2, 16, 16

    key = jax.random.PRNGKey(0)
    kx, kw, kb = jax.random.split(key, 3)

    x = jax.random.normal(kx, (N, in_channels, H, W), dtype=jnp.float32)
    # PyTorch Conv2d weight shape: (out_channels, in_channels, 1, 1)
    fan_in = float(in_channels)  # kernel_size=1
    bound = 1.0 / (fan_in ** 0.5)
    weight = jax.random.uniform(
        kw, (out_channels, in_channels, 1, 1), minval=-bound, maxval=bound,
        dtype=jnp.float32)
    bias = jax.random.uniform(
        kb, (out_channels,), minval=-bound, maxval=bound, dtype=jnp.float32)

    out = jax.block_until_ready(outconv_forward_jit(x, weight, bias))

    # Reference check against plain JAX conv semantics (NCHW, 1x1 kernel).
    ref = jax.lax.conv_general_dilated(
        x, weight, window_strides=(1, 1), padding="VALID",
        dimension_numbers=("NCHW", "OIHW", "NCHW"),
    ) + bias.reshape(1, out_channels, 1, 1)
    assert out.shape == (N, out_channels, H, W)
    assert jnp.allclose(out, ref, atol=1e-5, rtol=1e-5)

    print("KERNEL_OK")
</pallas_src>

<mosaic_0001>
module attributes {stable_mosaic.version = 11 : i64} {
  func.func @kernel(%arg0: i32, %arg1: i32, %arg2: memref<3x4xf32, #tpu.memory_space<smem>>, %arg3: memref<3xf32, #tpu.memory_space<smem>>, %arg4: memref<1x4x2x128xf32, #tpu.memory_space<vmem>>, %arg5: memref<1x3x2x128xf32, #tpu.memory_space<vmem>>) attributes {dimension_semantics = [#tpu.dimension_semantics<parallel>, #tpu.dimension_semantics<parallel>], iteration_bounds = array<i64: 2, 1>, scalar_prefetch = 0 : i64, scratch_operands = 0 : i64, tpu.core_type = #tpu.core_type<tc>, window_params = [{transform_indices = @transform_0, window_bounds = array<i64: 3, 4>}, {transform_indices = @transform_1, window_bounds = array<i64: 3>}, {transform_indices = @transform_2, window_bounds = array<i64: 1, 4, 2, 128>}, {transform_indices = @transform_3, window_bounds = array<i64: 1, 3, 2, 128>}]} {
    %c0 = arith.constant 0 : index
    %c0_0 = arith.constant 0 : index
    %c0_1 = arith.constant 0 : index
    %c0_2 = arith.constant 0 : index
    %0 = vector.load %arg4[%c0, %c0_0, %c0_1, %c0_2] : memref<1x4x2x128xf32, #tpu.memory_space<vmem>>, vector<1x1x2x128xf32>
    %1 = vector.shape_cast %0 : vector<1x1x2x128xf32> to vector<2x128xf32>
    %c0_3 = arith.constant 0 : index
    %c0_4 = arith.constant 0 : index
    %2 = memref.load %arg2[%c0_3, %c0_4] : memref<3x4xf32, #tpu.memory_space<smem>>
    %3 = vector.broadcast %2 : f32 to vector<2x128xf32>
    %4 = arith.mulf %1, %3 : vector<2x128xf32>
    %c1 = arith.constant 1 : index
    %c0_5 = arith.constant 0 : index
    %5 = memref.load %arg2[%c1, %c0_5] : memref<3x4xf32, #tpu.memory_space<smem>>
    %6 = vector.broadcast %5 : f32 to vector<2x128xf32>
    %7 = arith.mulf %1, %6 : vector<2x128xf32>
    %c2 = arith.constant 2 : index
    %c0_6 = arith.constant 0 : index
    %8 = memref.load %arg2[%c2, %c0_6] : memref<3x4xf32, #tpu.memory_space<smem>>
    %9 = vector.broadcast %8 : f32 to vector<2x128xf32>
    %10 = arith.mulf %1, %9 : vector<2x128xf32>
    %c0_7 = arith.constant 0 : index
    %c1_8 = arith.constant 1 : index
    %c0_9 = arith.constant 0 : index
    %c0_10 = arith.constant 0 : index
    %11 = vector.load %arg4[%c0_7, %c1_8, %c0_9, %c0_10] : memref<1x4x2x128xf32, #tpu.memory_space<vmem>>, vector<1x1x2x128xf32>
    %12 = vector.shape_cast %11 : vector<1x1x2x128xf32> to vector<2x128xf32>
    %c0_11 = arith.constant 0 : index
    %c1_12 = arith.constant 1 : index
    %13 = memref.load %arg2[%c0_11, %c1_12] : memref<3x4xf32, #tpu.memory_space<smem>>
    %14 = vector.broadcast %13 : f32 to vector<2x128xf32>
    %15 = arith.mulf %12, %14 : vector<2x128xf32>
    %16 = arith.addf %4, %15 : vector<2x128xf32>
    %c1_13 = arith.constant 1 : index
    %c1_14 = arith.constant 1 : index
    %17 = memref.load %arg2[%c1_13, %c1_14] : memref<3x4xf32, #tpu.memory_space<smem>>
    %18 = vector.broadcast %17 : f32 to vector<2x128xf32>
    %19 = arith.mulf %12, %18 : vector<2x128xf32>
    %20 = arith.addf %7, %19 : vector<2x128xf32>
    %c2_15 = arith.constant 2 : index
    %c1_16 = arith.constant 1 : index
    %21 = memref.load %arg2[%c2_15, %c1_16] : memref<3x4xf32, #tpu.memory_space<smem>>
    %22 = vector.broadcast %21 : f32 to vector<2x128xf32>
    %23 = arith.mulf %12, %22 : vector<2x128xf32>
    %24 = arith.addf %10, %23 : vector<2x128xf32>
    %c0_17 = arith.constant 0 : index
    %c2_18 = arith.constant 2 : index
    %c0_19 = arith.constant 0 : index
    %c0_20 = arith.constant 0 : index
    %25 = vector.load %arg4[%c0_17, %c2_18, %c0_19, %c0_20] : memref<1x4x2x128xf32, #tpu.memory_space<vmem>>, vector<1x1x2x128xf32>
    %26 = vector.shape_cast %25 : vector<1x1x2x128xf32> to vector<2x128xf32>
    %c0_21 = arith.constant 0 : index
    %c2_22 = arith.constant 2 : index
    %27 = memref.load %arg2[%c0_21, %c2_22] : memref<3x4xf32, #tpu.memory_space<smem>>
    %28 = vector.broadcast %27 : f32 to vector<2x128xf32>
    %29 = arith.mulf %26, %28 : vector<2x128xf32>
    %30 = arith.addf %16, %29 : vector<2x128xf32>
    %c1_23 = arith.constant 1 : index
    %c2_24 = arith.constant 2 : index
    %31 = memref.load %arg2[%c1_23, %c2_24] : memref<3x4xf32, #tpu.memory_space<smem>>
    %32 = vector.broadcast %31 : f32 to vector<2x128xf32>
    %33 = arith.mulf %26, %32 : vector<2x128xf32>
    %34 = arith.addf %20, %33 : vector<2x128xf32>
    %c2_25 = arith.constant 2 : index
    %c2_26 = arith.constant 2 : index
    %35 = memref.load %arg2[%c2_25, %c2_26] : memref<3x4xf32, #tpu.memory_space<smem>>
    %36 = vector.broadcast %35 : f32 to vector<2x128xf32>
    %37 = arith.mulf %26, %36 : vector<2x128xf32>
    %38 = arith.addf %24, %37 : vector<2x128xf32>
    %c0_27 = arith.constant 0 : index
    %c3 = arith.constant 3 : index
    %c0_28 = arith.constant 0 : index
    %c0_29 = arith.constant 0 : index
    %39 = vector.load %arg4[%c0_27, %c3, %c0_28, %c0_29] : memref<1x4x2x128xf32, #tpu.memory_space<vmem>>, vector<1x1x2x128xf32>
    %40 = vector.shape_cast %39 : vector<1x1x2x128xf32> to vector<2x128xf32>
    %c0_30 = arith.constant 0 : index
    %c3_31 = arith.constant 3 : index
    %41 = memref.load %arg2[%c0_30, %c3_31] : memref<3x4xf32, #tpu.memory_space<smem>>
    %42 = vector.broadcast %41 : f32 to vector<2x128xf32>
    %43 = arith.mulf %40, %42 : vector<2x128xf32>
    %44 = arith.addf %30, %43 : vector<2x128xf32>
    %c1_32 = arith.constant 1 : index
    %c3_33 = arith.constant 3 : index
    %45 = memref.load %arg2[%c1_32, %c3_33] : memref<3x4xf32, #tpu.memory_space<smem>>
    %46 = vector.broadcast %45 : f32 to vector<2x128xf32>
    %47 = arith.mulf %40, %46 : vector<2x128xf32>
    %48 = arith.addf %34, %47 : vector<2x128xf32>
    %c2_34 = arith.constant 2 : index
    %c3_35 = arith.constant 3 : index
    %49 = memref.load %arg2[%c2_34, %c3_35] : memref<3x4xf32, #tpu.memory_space<smem>>
    %50 = vector.broadcast %49 : f32 to vector<2x128xf32>
    %51 = arith.mulf %40, %50 : vector<2x128xf32>
    %52 = arith.addf %38, %51 : vector<2x128xf32>
    %c0_36 = arith.constant 0 : index
    %53 = memref.load %arg3[%c0_36] : memref<3xf32, #tpu.memory_space<smem>>
    %54 = vector.broadcast %53 : f32 to vector<2x128xf32>
    %55 = arith.addf %44, %54 : vector<2x128xf32>
    %c0_37 = arith.constant 0 : index
    %c0_38 = arith.constant 0 : index
    %c0_39 = arith.constant 0 : index
    %c0_40 = arith.constant 0 : index
    %56 = vector.load %arg5[%c0_37, %c0_38, %c0_39, %c0_40] : memref<1x3x2x128xf32, #tpu.memory_space<vmem>>, vector<1x1x2x128xf32>
    %57 = vector.shape_cast %56 : vector<1x1x2x128xf32> to vector<2x128xf32>
    %58 = vector.shape_cast %55 : vector<2x128xf32> to vector<1x1x2x128xf32>
    tpu.vector_store %arg5[%c0_37, %c0_38, %c0_39, %c0_40], %58 {strides = array<i32>} : memref<1x3x2x128xf32, #tpu.memory_space<vmem>>, vector<1x1x2x128xf32>,
    %c1_41 = arith.constant 1 : index
    %59 = memref.load %arg3[%c1_41] : memref<3xf32, #tpu.memory_space<smem>>
    %60 = vector.broadcast %59 : f32 to vector<2x128xf32>
    %61 = arith.addf %48, %60 : vector<2x128xf32>
    %c0_42 = arith.constant 0 : index
    %c1_43 = arith.constant 1 : index
    %c0_44 = arith.constant 0 : index
    %c0_45 = arith.constant 0 : index
    %62 = vector.load %arg5[%c0_42, %c1_43, %c0_44, %c0_45] : memref<1x3x2x128xf32, #tpu.memory_space<vmem>>, vector<1x1x2x128xf32>
    %63 = vector.shape_cast %62 : vector<1x1x2x128xf32> to vector<2x128xf32>
    %64 = vector.shape_cast %61 : vector<2x128xf32> to vector<1x1x2x128xf32>
    tpu.vector_store %arg5[%c0_42, %c1_43, %c0_44, %c0_45], %64 {strides = array<i32>} : memref<1x3x2x128xf32, #tpu.memory_space<vmem>>, vector<1x1x2x128xf32>,
    %c2_46 = arith.constant 2 : index
    %65 = memref.load %arg3[%c2_46] : memref<3xf32, #tpu.memory_space<smem>>
    %66 = vector.broadcast %65 : f32 to vector<2x128xf32>
    %67 = arith.addf %52, %66 : vector<2x128xf32>
    %c0_47 = arith.constant 0 : index
    %c2_48 = arith.constant 2 : index
    %c0_49 = arith.constant 0 : index
    %c0_50 = arith.constant 0 : index
    %68 = vector.load %arg5[%c0_47, %c2_48, %c0_49, %c0_50] : memref<1x3x2x128xf32, #tpu.memory_space<vmem>>, vector<1x1x2x128xf32>
    %69 = vector.shape_cast %68 : vector<1x1x2x128xf32> to vector<2x128xf32>
    %70 = vector.shape_cast %67 : vector<2x128xf32> to vector<1x1x2x128xf32>
    tpu.vector_store %arg5[%c0_47, %c2_48, %c0_49, %c0_50], %70 {strides = array<i32>} : memref<1x3x2x128xf32, #tpu.memory_space<vmem>>, vector<1x1x2x128xf32>,
    return
  }
  func.func @transform_0(%arg0: i32, %arg1: i32) -> (i32, i32) {
    %c0_i32 = arith.constant 0 : i32
    %c0_i32_0 = arith.constant 0 : i32
    %c0_i32_1 = arith.constant 0 : i32
    return %c0_i32, %c0_i32_0 : i32, i32
  }
  func.func @transform_1(%arg0: i32, %arg1: i32) -> i32 {
    %c0_i32 = arith.constant 0 : i32
    %c0_i32_0 = arith.constant 0 : i32
    return %c0_i32 : i32
  }
  func.func @transform_2(%arg0: i32, %arg1: i32) -> (i32, i32, i32, i32) {
    %c0_i32 = arith.constant 0 : i32
    %c0_i32_0 = arith.constant 0 : i32
    %c0_i32_1 = arith.constant 0 : i32
    return %arg0, %c0_i32, %arg1, %c0_i32_0 : i32, i32, i32, i32
  }
  func.func @transform_3(%arg0: i32, %arg1: i32) -> (i32, i32, i32, i32) {
    %c0_i32 = arith.constant 0 : i32
    %c0_i32_0 = arith.constant 0 : i32
    %c0_i32_1 = arith.constant 0 : i32
    return %arg0, %c0_i32, %arg1, %c0_i32_0 : i32, i32, i32, i32
  }
}

</mosaic_0001>

<bundles_post_ra>
// kernel: outconv_forward.1
= control target key start
LH: loop header
LB: loop body
LE: loop exit
PB: predicated region body
PF: predicated region fallthrough
CT: control target
= control target key end

     0   :  { %8 = vsyncpa [#allocation3], 0  ;;  %s650_s0 = inlined_call_operand.vmem [shape: f32[3,4], index: 0, kind: input, shape index: {}]   ;;  %s651_s1 = inlined_call_operand.vmem [shape: f32[3], index: 1, kind: input, shape index: {}]   ;;  %s652_s2 = inlined_call_operand.vmem [shape: f32[2,4,2,128], index: 2, kind: input, shape index: {}]   ;;  %s653_s3 = inlined_call_operand.vmem [shape: f32[2,3,2,128], index: 3, kind: output, shape index: {}]  }
   0x1   :  { %9 = vsyncpa [#allocation5], 0  ;;  %s564_s12 = smov 0   ;;  %s566_s13 = smov 0  }
   0x2   :  { %s568_s14 = smov 0  }
   0x3 LB: > { %s401_s15 = sadd.s32 4294967295, %s540_s14   ;;  %s27_s16 = sadd.s32 1, %s536_s13  ;;  %s540_s14 = sphi %s568_s14, %s15_s14   ;;  %s536_s13 = sphi %s566_s13, %s663_s13   ;;  %s532_s12 = sphi %s564_s12, %s662_s12  }
   0x4   : > { %p29_p0 = scmp.ge.s32.totalorder %s27_s16, 2  ;;  %p403_p1 = scmp.ge.s32.totalorder %s540_s14, 1 }
   0x5   : > { %p130_p2 = scmp.lt.s32.totalorder %s540_s14, 3  ;;  %p589_p4 = scmp.eq.s32.totalorder %s401_s15, 0 }
   0x6   : > { %s665_s16 = smov (%p29_p0, %s27_s16), 0  ;;  %s143_s21 = sshll.u32 %s650_s0, 4  ;;  %s144_s21 = int_to_ptr.vmem [resolvable:$true] %s143_s21 }
   0x7   : > { %p585_p3 = pnand %p403_p1, %p130_p2  ;;  %s154_s24 = sshll.u32 %s651_s1, 4  ;;  %s155_s24 = int_to_ptr.vmem [resolvable:$true] %s154_s24 }
   0x8   : > { %s658_s18 = scalar_select %p589_p4, 1, 0 }
   0x9   : > { %s657_s17 = scalar_select %p585_p3, 1, 0 }
   0xa   : > { %p443_p5 = pneg %p585_p3  ;;  %s480_s26 = scalar_lea.vmem %s144_s21, 64 }
   0xb   : > { %p481_p7 = scmp.ne.s32.totalorder %s144_s21, %s480_s26  ;;  %p488_p11 = scmp.lt.s32.totalorder %s144_s21, %s144_s21 }
   0xc   : > { %p603_p6 = pnand %p589_p4, %p443_p5  ;;  %p489_p12 = scmp.lt.s32.totalorder %s480_s26, %s480_s26 }
   0xe   : > { %p482_p8 = pneg %p603_p6  ;;  %p490_p13 = por %p489_p12, %p488_p11 }
  0x10   : > { %p483_p9 = pnand %p482_p8, %p481_p7 }
  0x12   : > { %p484_p10 = pneg %p483_p9 }
  0x14   : > { %p491_p0 = pnand %p490_p13, %p484_p10 }
  0x16   : > { %494 = shalt.err (!%p491_p0)
}
  0x17   : > { %s542_s27 = smov [#allocation2]   ;;  %s495_s28 = scalar_lea.vmem %s155_s24, 16 }
  0x18   : > { %446 = dma.vmem_to_smem (!%p603_p6), %s144_s21, 64, %s542_s27, [#allocation3]  }
  0x19   : > { %p496_p1 = scmp.ne.s32.totalorder %s155_s24, %s495_s28  ;;  %p503_p4 = scmp.lt.s32.totalorder %s155_s24, %s155_s24 }
  0x1a   : > { %p504_p3 = scmp.lt.s32.totalorder %s495_s28, %s495_s28 }
  0x1b   : > { %p498_p2 = pnand %p496_p1, %p482_p8 }
  0x1c   : > { %p505_p7 = por %p504_p3, %p503_p4 }
  0x1d   : > { %p499_p5 = pneg %p498_p2 }
  0x1f   : > { %p506_p9 = pnand %p505_p7, %p499_p5 }
  0x21   : > { %509 = shalt.err (!%p506_p9)
}
  0x22   : > { %s543_s29 = smov [#allocation4]   ;;  %p660_p10 = scmp.ne.s32.totalorder %s657_s17, 0 }
  0x23   : > { %449 = dma.vmem_to_smem (!%p603_p6), %s155_s24, 16, %s543_s29, [#allocation5]  }
  0x24   : > { %178 = sbr.rel (%p660_p10) target bundleno = 74 (0x4a), region = 32  ;;  %p661_p11 = scmp.ne.s32.totalorder (!%p660_p10), %s658_s18, 0 }
  0x2b   : > { %523 = dma.done.wait (%p661_p11), [#allocation3], 64  }
  0x2c   : > { %525 = vsyncadd (%p661_p11), [#allocation3], 4294967232 }
  0x2d   : > { %527 = dma.done.wait (%p661_p11), [#allocation5], 16  }
  0x2e   : > { %529 = vsyncadd (%p661_p11), [#allocation5], 4294967280 }
  0x2f   : > { %188 = sfence }
  0x30   : > { %p213_p3 = scmp.lt.s32.totalorder %s532_s12, 1  ;;  %s230_s30 = sld [smem:[#allocation2]] }
  0x31   : > { %s416_s4 = sld [smem:[#allocation2 + $0x1]]  ;;  %s420_s5 = sld [smem:[#allocation2 + $0x2]] }
  0x32   : > { %s667_s12 = smov (!%p213_p3, %s532_s12), 1  ;;  %s424_s6 = sld [smem:[#allocation2 + $0x3]] }
  0x33   : > { %s433_s7 = sshll.u32 %s667_s12, 3  ;;  %s628_s8 = sld [smem:[#allocation4]] }
  0x34   : > { %s220_s11 = scalar_lea.vmem %s652_s2, %s433_s7  ;;  %s413_s15 = sld [smem:[#allocation2 + $0x80]] }
  0x35   : > { %v229_v0 = vld [vmem:[%s220_s11] sm:$0x3]  ;;  %v415_v2 = vld [vmem:[%s220_s11 + $0x2] sm:$0x3]  ;;  %v419_v3 = vld [vmem:[%s220_s11 + $0x4] sm:$0x3] }
  0x36   : > { %v231_v1 = vstv %s230_s30  ;;  %v423_v7 = vld [vmem:[%s220_s11 + $0x6] sm:$0x3]  ;;  %s417_s17 = sld [smem:[#allocation2 + $0x81]]  ;;  %s421_s18 = sld [smem:[#allocation2 + $0x82]] }
  0x37   : > { %v232_v4 = vmul.f32 %v231_v1, %v229_v0  ;;  %v242_v5 = vstv %s416_s4  ;;  %v256_v6 = vstv %s420_s5  ;;  %s425_s19 = sld [smem:[#allocation2 + $0x83]]  ;;  %s414_s20 = sld [smem:[#allocation2 + $0x100]] }
  0x38   : > { %v243_v8 = vmul.f32 %v415_v2, %v242_v5  ;;  %v257_v9 = vmul.f32 %v419_v3, %v256_v6  ;;  %v270_v10 = vstv %s424_s6  ;;  %s418_s21 = sld [smem:[#allocation2 + $0x101]]  ;;  %s422_s22 = sld [smem:[#allocation2 + $0x102]] }
  0x39   : > { %v271_v12 = vmul.f32 %v423_v7, %v270_v10  ;;  %s426_s23 = sld [smem:[#allocation2 + $0x103]]  ;;  %s434_s24 = smul.u32 6, %s667_s12  ;;  %v282_v16 = vstv %s628_s8 }
  0x3a   : > { %v244_v11 = vadd.f32 %v243_v8, %v232_v4  ;;  %v234_v13 = vstv %s413_s15  ;;  %s634_s25 = sld [smem:[#allocation4 + $0x1]]  ;;  %s429_s26 = sld [smem:[#allocation4 + $0x2]] }
  0x3b   : > { %v235_v15 = vmul.f32 %v234_v13, %v229_v0  ;;  %s228_s29 = scalar_lea.vmem %s653_s3, %s434_s24 }
  0x3c   : > { %v258_v14 = vadd.f32 %v257_v9, %v244_v11  ;;  %v246_v17 = vstv %s417_s17  ;;  %v260_v18 = vstv %s421_s18 }
  0x3d   : > { %v247_v20 = vmul.f32 %v415_v2, %v246_v17  ;;  %v261_v21 = vmul.f32 %v419_v3, %v260_v18  ;;  %v274_v22 = vstv %s425_s19  ;;  %v237_v24 = vstv %s414_s20 }
  0x3e   : > { %v272_v19 = vadd.f32 %v271_v12, %v258_v14  ;;  %v275_v23 = vmul.f32 %v423_v7, %v274_v22  ;;  %v250_v25 = vstv %s418_s21  ;;  %v238_v28 = vmul.f32 %v237_v24, %v229_v0 }
  0x3f   : > { %v248_v27 = vadd.f32 %v247_v20, %v235_v15  ;;  %v251_v29 = vmul.f32 %v415_v2, %v250_v25  ;;  %v264_v30 = vstv %s422_s22  ;;  %v278_v31 = vstv %s426_s23 }
  0x40   : > { %v283_v26 = vadd.f32 %v282_v16, %v272_v19  ;;  %v265_v34 = vmul.f32 %v419_v3, %v264_v30  ;;  %v279_v35 = vmul.f32 %v423_v7, %v278_v31  ;;  %v286_v36 = vstv %s634_s25 }
  0x41   : > { %v262_v32 = vadd.f32 %v261_v21, %v248_v27  ;;  %v252_v33 = vadd.f32 %v251_v29, %v238_v28  ;;  %v291_v39 = vstv %s429_s26 }
  0x42   : > { %284 = vst [vmem:[%s228_s29] sm:$0x3] %v283_v26 }
  0x43   : > { %v276_v37 = vadd.f32 %v275_v23, %v262_v32  ;;  %v266_v38 = vadd.f32 %v265_v34, %v252_v33 }
  0x45   : > { %v287_v40 = vadd.f32 %v286_v36, %v276_v37  ;;  %v280_v41 = vadd.f32 %v279_v35, %v266_v38 }
  0x47   : > { %428 = vst [vmem:[%s228_s29 + $0x2] sm:$0x3] %v287_v40  ;;  %v292_v42 = vadd.f32 %v291_v39, %v280_v41 }
  0x49   : > { %430 = vst [vmem:[%s228_s29 + $0x4] sm:$0x3] %v292_v42 }
  0x4a PF: > { %s15_s14 = sadd.s32 1, %s540_s14   ;;  %s662_s12 = smov %s536_s13 }
  0x4b   : > { %p12_p4 = scmp.ge.s32.totalorder %s15_s14, 4   ;;  %s663_s13 = smov %s665_s16 }
  0x4d   :  { %14 = sbr.rel (!%p12_p4) target bundleno = 3 (0x3), region = 76 }
  0x54   :  { %322 = vsyncpa [#allocation3], 1 }
  0x55   :  { %324 = vsyncpa [#allocation3 + $0x1], 1 }
  0x56   :  { %325 = vsyncpa [#allocation5], 1 }

</bundles_post_ra>
